<compile_context>
chip_gen: v7x
topology: tpu7x:2x2x1
jax: 0.10.0
libtpu: 0.0.40
codegen_flags: <defaults>
</compile_context>

<pallas_src>
import functools

import jax
import jax.numpy as jnp
from jax.experimental import pallas as pl
from jax.experimental.pallas import tpu as pltpu


def _round_up(x, m):
    return ((x + m - 1) // m) * m


def _pick_tile(cap, extent):
    """Largest 128 * 2^j tile <= min(cap, extent); extent is >= 128."""
    t = 128
    while t * 2 <= min(cap, extent):
        t *= 2
    return t


def _vmem_limit_bytes():
    """Scoped-VMEM limit with per-generation headroom (v7x has 64 MiB/TC)."""
    try:
        phys = int(pltpu.get_tpu_info().vmem_capacity_bytes)
    except Exception:
        phys = 64 * 1024 * 1024  # conservative fallback (v7x per-TensorCore)
    return min(phys - (16 << 20), 96 << 20)


def _xw_kernel(x_ref, wt_ref, h_ref, acc_ref):
    # Prologue: H = X @ W^T, K-tiled over in_feats, f32 accumulate, bf16 emit.
    k = pl.program_id(1)

    @pl.when(k == 0)
    def _():
        acc_ref[...] = jnp.zeros_like(acc_ref)

    acc_ref[...] += jnp.dot(
        x_ref[...], wt_ref[...], preferred_element_type=jnp.float32
    )

    @pl.when(k == pl.num_programs(1) - 1)
    def _():
        h_ref[...] = acc_ref[...].astype(h_ref.dtype)


def _gcn_agg_kernel(adj_ref, h_ref, b_ref, o_ref, *, tk, h_resident):
    # adj_ref: (tm, tk) int8 (exact 0/1), upcast to bf16 for the native MXU path
    # h_ref:   (n_pad, out_pad) bf16 if resident, else (tk, out_pad) bf16
    # b_ref:   (1, out_pad) f32
    # o_ref:   (tm, out_pad) f32 -- VMEM-resident across k (index_map = (i, 0)),
    #          used directly as the accumulator (no extra scratch).
    k = pl.program_id(1)

    @pl.when(k == 0)
    def _():
        o_ref[...] = jnp.zeros_like(o_ref)

    a = adj_ref[...].astype(jnp.bfloat16)  # 0/1 -> bf16 is exact
    if h_resident:
        start = pl.multiple_of(k * tk, 128)
        h = h_ref[pl.ds(start, tk), :]
    else:
        h = h_ref[...]
    o_ref[...] += jnp.dot(a, h, preferred_element_type=jnp.float32)

    @pl.when(k == pl.num_programs(1) - 1)
    def _():
        # Node-apply: bias + ReLU fused into the final (resident) block.
        o_ref[...] = jnp.maximum(o_ref[...] + b_ref[...], 0.0)


def gcn_forward(adj, x, w, b, *, tile_m=512, tile_k=1024, tile_k_in=512):
    """GCN forward: relu(A @ X @ W^T + b).

    adj: [N, N] 0/1 dense adjacency (edge j -> i), x: [N, in_f],
    w: [out_f, in_f] (torch.nn.Linear layout), b: [out_f]  ->  [N, out_f]
    """
    n, in_f = x.shape
    out_f = w.shape[0]

    # ---- tiling plan (tiles are 128 * 2^j; N padded to the tile multiple) ----
    n128 = _round_up(n, 128)
    tm = _pick_tile(tile_m, n128)
    tk = _pick_tile(tile_k, n128)
    n_pad = _round_up(n, max(tm, tk))  # divisible by both tm and tk

    in128 = _round_up(in_f, 128)
    tki = _pick_tile(tile_k_in, in128)
    in_pad = _round_up(in_f, tki)

    out_pad = _round_up(out_f, 128)  # lane-dense H / output

    vmem_limit = _vmem_limit_bytes()

    # Keep H fully VMEM-resident in the main kernel when it fits (count 2x to
    # be safe against double-buffering); otherwise stream (tk, out_pad) tiles.
    h_bytes = n_pad * out_pad * 2  # bf16
    fixed_bytes = 2 * tm * tk + 2 * tm * out_pad * 4 + 2 * out_pad * 4
    h_resident = fixed_bytes + 2 * h_bytes <= vmem_limit - (4 << 20)

    # ---- layout plumbing (zero padding is mathematically inert) ----
    x_pad = jnp.zeros((n_pad, in_pad), jnp.float32).at[:n, :in_f].set(
        x.astype(jnp.float32))
    wt_pad = jnp.zeros((in_pad, out_pad), jnp.float32).at[:in_f, :out_f].set(
        w.T.astype(jnp.float32))
    b_pad = jnp.zeros((1, out_pad), jnp.float32).at[0, :out_f].set(
        b.astype(jnp.float32))
    # int8 adjacency (0/1 exact): half the HBM bytes of bf16, quarter of f32.
    # NOTE: for a static graph, hoist this pad+cast out of the per-call path.
    adj_i8 = jnp.zeros((n_pad, n_pad), jnp.int8).at[:n, :n].set(
        adj.astype(jnp.int8))

    # ---- prologue: H = X @ W^T (K-tiled over in_feats), emitted in bf16 ----
    h = pl.pallas_call(
        _xw_kernel,
        out_shape=jax.ShapeDtypeStruct((n_pad, out_pad), jnp.bfloat16),
        grid_spec=pltpu.PrefetchScalarGridSpec(
            num_scalar_prefetch=0,
            grid=(n_pad // tm, in_pad // tki),
            in_specs=[
                pl.BlockSpec((tm, tki), lambda i, k: (i, k)),
                pl.BlockSpec((tki, out_pad), lambda i, k: (k, 0)),
            ],
            out_specs=pl.BlockSpec((tm, out_pad), lambda i, k: (i, 0)),
            scratch_shapes=[pltpu.VMEM((tm, out_pad), jnp.float32)],
        ),
        compiler_params=pltpu.CompilerParams(
            dimension_semantics=("parallel", "arbitrary"),
            vmem_limit_bytes=vmem_limit,
        ),
    )(x_pad, wt_pad)

    # ---- main kernel: out = relu(A @ H + b), K-tiled over neighbors ----
    if h_resident:
        h_spec = pl.BlockSpec((n_pad, out_pad), lambda i, k: (0, 0))  # fetch once
    else:
        h_spec = pl.BlockSpec((tk, out_pad), lambda i, k: (k, 0))

    kernel = functools.partial(_gcn_agg_kernel, tk=tk, h_resident=h_resident)

    out_full = pl.pallas_call(
        kernel,
        out_shape=jax.ShapeDtypeStruct((n_pad, out_pad), jnp.float32),
        grid_spec=pltpu.PrefetchScalarGridSpec(
            num_scalar_prefetch=0,
            grid=(n_pad // tm, n_pad // tk),
            in_specs=[
                pl.BlockSpec((tm, tk), lambda i, k: (i, k)),      # int8 adjacency
                h_spec,                                           # H (bf16)
                pl.BlockSpec((1, out_pad), lambda i, k: (0, 0)),  # bias
            ],
            out_specs=pl.BlockSpec((tm, out_pad), lambda i, k: (i, 0)),
        ),
        compiler_params=pltpu.CompilerParams(
            dimension_semantics=("parallel", "arbitrary"),
            vmem_limit_bytes=vmem_limit,
        ),
    )(adj_i8, h, b_pad)

    return out_full[:n, :out_f].astype(x.dtype)


if __name__ == "__main__":
    key = jax.random.PRNGKey(0)
    k_adj, k_x, k_w, k_b = jax.random.split(key, 4)

    N = 64        # number of nodes
    IN_F = 32     # in_feats
    OUT_F = 16    # out_feats

    # Deterministic synthetic graph: dense binary adjacency (edge j -> i).
    adj = (jax.random.uniform(k_adj, (N, N)) < 0.25).astype(jnp.float32)
    x = jax.random.normal(k_x, (N, IN_F), dtype=jnp.float32)

    # nn.Linear(in_feats, out_feats): weight [out_f, in_f], bias [out_f].
    w = (jax.random.normal(k_w, (OUT_F, IN_F), dtype=jnp.float32)
         * (1.0 / jnp.sqrt(IN_F)))
    b = jax.random.normal(k_b, (OUT_F,), dtype=jnp.float32) * 0.01

    out = jax.block_until_ready(gcn_forward(adj, x, w, b))
    assert out.shape == (N, OUT_F)

    hp = jax.lax.Precision.HIGHEST
    h_true = jnp.dot(x, w.T, precision=hp)

    # Quantization-aware reference: the kernel deliberately stores H = X @ W^T
    # in bf16 (input rounding only; accumulation stays f32).
    h_q = h_true.astype(jnp.bfloat16).astype(jnp.float32)
    ref_q = jnp.maximum(jnp.dot(adj, h_q, precision=hp) + b[None, :], 0.0)
    assert jnp.allclose(out, ref_q, atol=2e-2, rtol=2e-2), float(
        jnp.max(jnp.abs(out - ref_q)))

    # Full-f32 reference (semantic check; tolerance covers bf16 H rounding).
    ref = jnp.maximum(jnp.dot(adj, h_true, precision=hp) + b[None, :], 0.0)
    assert jnp.allclose(out, ref, atol=5e-2, rtol=5e-2), float(
        jnp.max(jnp.abs(out - ref)))

    print("KERNEL_OK")
</pallas_src>

<mosaic_0001>
module attributes {stable_mosaic.version = 11 : i64} {
  func.func @_xw_kernel(%arg0: i32, %arg1: i32, %arg2: memref<128x128xf32, #tpu.memory_space<vmem>>, %arg3: memref<128x128xf32, #tpu.memory_space<vmem>>, %arg4: memref<128x128xbf16, #tpu.memory_space<vmem>>, %arg5: memref<128x128xf32, #tpu.memory_space<vmem>>) attributes {dimension_semantics = [#tpu.dimension_semantics<parallel>, #tpu.dimension_semantics<arbitrary>], iteration_bounds = array<i64: 1, 1>, scalar_prefetch = 0 : i64, scratch_operands = 1 : i64, tpu.core_type = #tpu.core_type<tc>, window_params = [{transform_indices = @transform_0, window_bounds = array<i64: 128, 128>}, {transform_indices = @transform_1, window_bounds = array<i64: 128, 128>}, {transform_indices = @transform_2, window_bounds = array<i64: 128, 128>}]} {
    %c0_i32 = arith.constant 0 : i32
    %0 = arith.cmpi eq, %arg1, %c0_i32 : i32
    %1 = arith.extui %0 : i1 to i32
    %c0_i32_0 = arith.constant 0 : i32
    %2 = arith.cmpi ne, %1, %c0_i32_0 : i32
    scf.if %2 {
      %cst_10 = arith.constant 0.000000e+00 : f32
      %12 = vector.broadcast %cst_10 : f32 to vector<128x128xf32>
      %c0_11 = arith.constant 0 : index
      %c0_12 = arith.constant 0 : index
      %13 = vector.load %arg5[%c0_11, %c0_12] : memref<128x128xf32, #tpu.memory_space<vmem>>, vector<128x128xf32>
      tpu.vector_store %arg5[%c0_11, %c0_12], %12 {strides = array<i32>} : memref<128x128xf32, #tpu.memory_space<vmem>>, vector<128x128xf32>,
    } else {
    }
    %c0 = arith.constant 0 : index
    %c0_1 = arith.constant 0 : index
    %3 = vector.load %arg5[%c0, %c0_1] : memref<128x128xf32, #tpu.memory_space<vmem>>, vector<128x128xf32>
    %c0_2 = arith.constant 0 : index
    %c0_3 = arith.constant 0 : index
    %4 = vector.load %arg2[%c0_2, %c0_3] : memref<128x128xf32, #tpu.memory_space<vmem>>, vector<128x128xf32>
    %c0_4 = arith.constant 0 : index
    %c0_5 = arith.constant 0 : index
    %5 = vector.load %arg3[%c0_4, %c0_5] : memref<128x128xf32, #tpu.memory_space<vmem>>, vector<128x128xf32>
    %cst = arith.constant dense<0.000000e+00> : vector<128x128xf32>
    %6 = tpu.matmul %4, %5, %cst {dimension_numbers = #tpu.dot_dimension_numbers<[1], [0], [0], [1], [0, 0, 1, 1], [], []>} : vector<128x128xf32>, vector<128x128xf32>, vector<128x128xf32> -> vector<128x128xf32>
    %7 = arith.addf %3, %6 : vector<128x128xf32>
    %c0_6 = arith.constant 0 : index
    %c0_7 = arith.constant 0 : index
    %8 = vector.load %arg5[%c0_6, %c0_7] : memref<128x128xf32, #tpu.memory_space<vmem>>, vector<128x128xf32>
    tpu.vector_store %arg5[%c0_6, %c0_7], %7 {strides = array<i32>} : memref<128x128xf32, #tpu.memory_space<vmem>>, vector<128x128xf32>,
    %c0_i32_8 = arith.constant 0 : i32
    %9 = arith.cmpi eq, %arg1, %c0_i32_8 : i32
    %10 = arith.extui %9 : i1 to i32
    %c0_i32_9 = arith.constant 0 : i32
    %11 = arith.cmpi ne, %10, %c0_i32_9 : i32
    scf.if %11 {
      %c0_10 = arith.constant 0 : index
      %c0_11 = arith.constant 0 : index
      %12 = vector.load %arg5[%c0_10, %c0_11] : memref<128x128xf32, #tpu.memory_space<vmem>>, vector<128x128xf32>
      %13 = arith.truncf %12 : vector<128x128xf32> to vector<128x128xbf16>
      %c0_12 = arith.constant 0 : index
      %c0_13 = arith.constant 0 : index
      %14 = vector.load %arg4[%c0_12, %c0_13] : memref<128x128xbf16, #tpu.memory_space<vmem>>, vector<128x128xbf16>
      tpu.vector_store %arg4[%c0_12, %c0_13], %13 {strides = array<i32>} : memref<128x128xbf16, #tpu.memory_space<vmem>>, vector<128x128xbf16>,
    } else {
    }
    return
  }
  func.func @transform_0(%arg0: i32, %arg1: i32) -> (i32, i32) {
    %c0_i32 = arith.constant 0 : i32
    return %arg0, %arg1 : i32, i32
  }
  func.func @transform_1(%arg0: i32, %arg1: i32) -> (i32, i32) {
    %c0_i32 = arith.constant 0 : i32
    %c0_i32_0 = arith.constant 0 : i32
    return %arg1, %c0_i32 : i32, i32
  }
  func.func @transform_2(%arg0: i32, %arg1: i32) -> (i32, i32) {
    %c0_i32 = arith.constant 0 : i32
    %c0_i32_0 = arith.constant 0 : i32
    return %arg0, %c0_i32 : i32, i32
  }
}

</mosaic_0001>

<bundles_post_ra>
// kernel: tpu_custom_call.1
= control target key start
LH: loop header
LB: loop body
LE: loop exit
PB: predicated region body
PF: predicated region fallthrough
CT: control target
= control target key end

     0   :  { %7 = vsyncpa [#allocation4], 0  ;;  %s754_s0 = inlined_call_operand.hbm [shape: f32[128,128], index: 0, kind: input, shape index: {}]   ;;  %s755_s1 = inlined_call_operand.hbm [shape: f32[128,128], index: 1, kind: input, shape index: {}]   ;;  %s756_s2 = inlined_call_operand.hbm [shape: bf16[128,128], index: 2, kind: output, shape index: {}]  }
   0x1   :  { %8 = vsyncpa [#allocation7], 0 }
   0x2   :  { %9 = vsyncpa [#allocation5], 0  ;;  %s696_s9 = smov [#allocation3]   ;;  %s624_s13 = scalar_lea.hbm %s754_s0, 2048 }
   0x3   :  { %s15_s10 = sshll.u32 %s696_s9, 4  ;;  %p625_p0 = scmp.ne.s32.totalorder %s754_s0, %s624_s13  ;;  %s16_s10 = int_to_ptr.vmem [resolvable:$true] %s15_s10 }
   0x4   :  { %p628_p1 = scmp.lt.u32.totalorder %s624_s13, %s754_s0 }
   0x6   :  { %p630_p2 = pnand %p628_p1, %p625_p0 }
   0x8   :  { %633 = shalt.err (!%p630_p2)
}
   0x9   :  { %s634_s18 = scalar_lea.vmem %s16_s10, 2048  ;;  %p639_p4 = scmp.lt.s32.totalorder %s16_s10, %s16_s10 }
   0xa   :  { %p635_p3 = scmp.ne.s32.totalorder %s16_s10, %s634_s18  ;;  %p640_p5 = scmp.lt.s32.totalorder %s634_s18, %s634_s18 }
   0xc   :  { %p641_p6 = por %p640_p5, %p639_p4 }
   0xe   :  { %p642_p7 = pnand %p641_p6, %p635_p3 }
  0x10   :  { %645 = shalt.err (!%p642_p7)
}
  0x11   :  { %s697_s19 = smov 128   ;;  %s698_s20 = smov 8  }
  0x12   :  { %21 = dma.hbm_to_vmem [thread:$0]  %s754_s0, 2048, %s16_s10, [#allocation4], %s697_s19, %s697_s19, %s698_s20  }
  0x13   :  { %s699_s23 = smov [#allocation6]   ;;  %s646_s27 = scalar_lea.hbm %s755_s1, 2048 }
  0x14   :  { %s27_s24 = sshll.u32 %s699_s23, 4  ;;  %p647_p8 = scmp.ne.s32.totalorder %s755_s1, %s646_s27  ;;  %s28_s24 = int_to_ptr.vmem [resolvable:$true] %s27_s24 }
  0x15   :  { %p650_p9 = scmp.lt.u32.totalorder %s646_s27, %s755_s1 }
  0x17   :  { %p652_p10 = pnand %p650_p9, %p647_p8 }
  0x19   :  { %655 = shalt.err (!%p652_p10)
}
  0x1a   :  { %s656_s4 = scalar_lea.vmem %s28_s24, 2048  ;;  %p661_p12 = scmp.lt.s32.totalorder %s28_s24, %s28_s24 }
  0x1b   :  { %p657_p11 = scmp.ne.s32.totalorder %s28_s24, %s656_s4  ;;  %p662_p13 = scmp.lt.s32.totalorder %s656_s4, %s656_s4 }
  0x1d   :  { %p663_p0 = por %p662_p13, %p661_p12 }
  0x1f   :  { %p664_p1 = pnand %p663_p0, %p657_p11 }
  0x21   :  { %667 = shalt.err (!%p664_p1)
}
  0x22   :  { %33 = dma.hbm_to_vmem [thread:$0]  %s755_s1, 2048, %s28_s24, [#allocation7], %s697_s19, %s697_s19, %s698_s20  }
  0x23   :  { %690 = dma.done.wait [#allocation4], 2048  }
  0x24   :  { %691 = vsyncadd [#allocation4], 4294965248 }
  0x25   :  { %692 = dma.done.wait [#allocation7], 2048  }
  0x26   :  { %693 = vsyncadd [#allocation7], 4294965248  ;;  %v92_v0 = vld [vmem:[#allocation6] sm:$0xff]  ;;  %v93_v1 = vld [vmem:[#allocation6 + $0x8] sm:$0xff]  ;;  %s700_s1 = smov [#allocation8]  }
  0x27   :  { %v94_v2 = vld [vmem:[#allocation6 + $0x10] sm:$0xff]  ;;  %v569_v3 = vpack.c.bf16 %v93_v1, %v92_v0  ;;  %v95_v4 = vld [vmem:[#allocation6 + $0x18] sm:$0xff]  ;;  %v96_v6 = vld [vmem:[#allocation6 + $0x20] sm:$0xff]  ;;  %s389_s6 = sshll.u32 %s700_s1, 4  ;;  %s390_s6 = int_to_ptr.vmem [resolvable:$true] %s389_s6 }
  0x28   :  { %v573_v5 = vpack.c.bf16 %v95_v4, %v94_v2  ;;  %v97_v7 = vld [vmem:[#allocation6 + $0x28] sm:$0xff]  ;;  %v76_v9 = vld [vmem:[#allocation3] sm:$0xff]  ;;  %v98_v11 = vld [vmem:[#allocation6 + $0x30] sm:$0xff]  ;;  %s668_s7 = scalar_lea.vmem %s390_s6, 1024  ;;  %p673_p3 = scmp.lt.s32.totalorder %s390_s6, %s390_s6 }
  0x29   :  { %570 = vmatprep.subr.bf16.mxu0 %v569_v3  ;;  %601 = vmatprep.subr.bf16.mxu1 %v569_v3  ;;  %v577_v8 = vpack.c.bf16 %v97_v7, %v96_v6  ;;  %v84_v10 = vld [vmem:[#allocation3 + $0x40] sm:$0xff]  ;;  %v99_v12 = vld [vmem:[#allocation6 + $0x38] sm:$0xff]  ;;  %v101_v15 = vld [vmem:[#allocation6 + $0x48] sm:$0xff]  ;;  %p669_p2 = scmp.ne.s32.totalorder %s390_s6, %s668_s7  ;;  %p674_p4 = scmp.lt.s32.totalorder %s668_s7, %s668_s7 }
  0x2a   :  { %572 = vmatpush3.bf16.msra.mxu0 %v569_v3  ;;  %609 = vmatpush3.bf16.msra.mxu1 %v569_v3  ;;  %v581_v13 = vpack.c.bf16 %v99_v12, %v98_v11  ;;  %v100_v14 = vld [vmem:[#allocation6 + $0x40] sm:$0xff]  ;;  %v102_v17 = vld [vmem:[#allocation6 + $0x50] sm:$0xff]  ;;  %v103_v18 = vld [vmem:[#allocation6 + $0x58] sm:$0xff] }
  0x2b   :  { %574 = vmatprep.subr.bf16.mxu0 %v573_v5  ;;  %602 = vmatprep.subr.bf16.mxu1 %v573_v5  ;;  %v585_v16 = vpack.c.bf16 %v101_v15, %v100_v14  ;;  %v589_v19 = vpack.c.bf16 %v103_v18, %v102_v17  ;;  %v104_v20 = vld [vmem:[#allocation6 + $0x60] sm:$0xff]  ;;  %v105_v21 = vld [vmem:[#allocation6 + $0x68] sm:$0xff]  ;;  %v106_v23 = vld [vmem:[#allocation6 + $0x70] sm:$0xff]  ;;  %p675_p5 = por %p674_p4, %p673_p3 }
  0x2c   :  { %545 = vmatprep.mubr.f32.mxu0 %v76_v9  ;;  %557 = vmatprep.mubr.f32.mxu1 %v84_v10  ;;  %v593_v22 = vpack.c.bf16 %v105_v21, %v104_v20  ;;  %v107_v24 = vld [vmem:[#allocation6 + $0x78] sm:$0xff]  ;;  %v77_v26 = vld [vmem:[#allocation3 + $0x8] sm:$0xff]  ;;  %v78_v28 = vld [vmem:[#allocation3 + $0x10] sm:$0xff] }
  0x2d   :  { %v597_v25 = vpack.c.bf16 %v107_v24, %v106_v23  ;;  %v85_v27 = vld [vmem:[#allocation3 + $0x48] sm:$0xff]  ;;  %v86_v29 = vld [vmem:[#allocation3 + $0x50] sm:$0xff]  ;;  %v79_v30 = vld [vmem:[#allocation3 + $0x18] sm:$0xff]  ;;  %p676_p6 = pnand %p675_p5, %p669_p2 }
  0x2e   :  { %576 = vmatpush3.bf16.msra.mxu0 %v573_v5  ;;  %610 = vmatpush3.bf16.msra.mxu1 %v573_v5  ;;  %v87_v31 = vld [vmem:[#allocation3 + $0x58] sm:$0xff]  ;;  %v80_v32 = vld [vmem:[#allocation3 + $0x20] sm:$0xff]  ;;  %v81_v34 = vld [vmem:[#allocation3 + $0x28] sm:$0xff] }
  0x2f   :  { %578 = vmatprep.subr.bf16.mxu0 %v577_v8  ;;  %603 = vmatprep.subr.bf16.mxu1 %v577_v8  ;;  %v88_v33 = vld [vmem:[#allocation3 + $0x60] sm:$0xff]  ;;  %v89_v35 = vld [vmem:[#allocation3 + $0x68] sm:$0xff]  ;;  %v82_v36 = vld [vmem:[#allocation3 + $0x30] sm:$0xff] }
  0x30   :  { %v90_v37 = vld [vmem:[#allocation3 + $0x70] sm:$0xff]  ;;  %v83_v38 = vld [vmem:[#allocation3 + $0x38] sm:$0xff] }
  0x31   :  { %v91_v39 = vld [vmem:[#allocation3 + $0x78] sm:$0xff] }
  0x32   :  { %580 = vmatpush3.bf16.msra.mxu0 %v577_v8  ;;  %611 = vmatpush3.bf16.msra.mxu1 %v577_v8 }
  0x33   :  { %582 = vmatprep.subr.bf16.mxu0 %v581_v13  ;;  %604 = vmatprep.subr.bf16.mxu1 %v581_v13 }
  0x36   :  { %584 = vmatpush3.bf16.msra.mxu0 %v581_v13  ;;  %612 = vmatpush3.bf16.msra.mxu1 %v581_v13 }
  0x37   :  { %586 = vmatprep.subr.bf16.mxu0 %v585_v16  ;;  %605 = vmatprep.subr.bf16.mxu1 %v585_v16 }
  0x3a   :  { %588 = vmatpush3.bf16.msra.mxu0 %v585_v16  ;;  %613 = vmatpush3.bf16.msra.mxu1 %v585_v16 }
  0x3b   :  { %590 = vmatprep.subr.bf16.mxu0 %v589_v19  ;;  %606 = vmatprep.subr.bf16.mxu1 %v589_v19 }
  0x3e   :  { %592 = vmatpush3.bf16.msra.mxu0 %v589_v19  ;;  %614 = vmatpush3.bf16.msra.mxu1 %v589_v19 }
  0x3f   :  { %594 = vmatprep.subr.bf16.mxu0 %v593_v22  ;;  %607 = vmatprep.subr.bf16.mxu1 %v593_v22 }
  0x42   :  { %596 = vmatpush3.bf16.msra.mxu0 %v593_v22  ;;  %615 = vmatpush3.bf16.msra.mxu1 %v593_v22 }
  0x43   :  { %598 = vmatprep.subr.bf16.mxu0 %v597_v25  ;;  %608 = vmatprep.subr.bf16.mxu1 %v597_v25 }
  0x46   :  { %600 = vmatpush3.bf16.msra.mxu0 %v597_v25  ;;  %616 = vmatpush3.bf16.msra.mxu1 %v597_v25 }
  0x49   :  { %546 = vmatmul.mubr.f32.vlgmr.msra.gmra.mrb[0].mxu0 %v77_v26  ;;  %558 = vmatmul.mubr.f32.vlgmr.msra.gmra.mrb[0].mxu1 %v85_v27 }
  0x4a   :  { %548 = vmatprep.mubr.f32.mxu0 %v78_v28  ;;  %560 = vmatprep.mubr.f32.mxu1 %v86_v29 }
  0x4d   :  { %549 = vmatmul.mubr.f32.gmra.mrb[2].mxu0 %v79_v30  ;;  %561 = vmatmul.mubr.f32.gmra.mrb[2].mxu1 %v87_v31 }
  0x4e   :  { %551 = vmatprep.mubr.f32.mxu0 %v80_v32  ;;  %563 = vmatprep.mubr.f32.mxu1 %v88_v33 }
  0x51   :  { %552 = vmatmul.mubr.f32.gmra.mrb[4].mxu0 %v81_v34  ;;  %564 = vmatmul.mubr.f32.gmra.mrb[4].mxu1 %v89_v35 }
  0x52   :  { %554 = vmatprep.mubr.f32.mxu0 %v82_v36  ;;  %566 = vmatprep.mubr.f32.mxu1 %v90_v37 }
  0x55   :  { %555 = vmatmul.mubr.f32.gmra.mrb[6].mxu0 %v83_v38  ;;  %567 = vmatmul.mubr.f32.gmra.mrb[6].mxu1 %v91_v39 }
 0x11c   :  { %v547_v40 = vpop.f32.mrb[0].mxu0  ;;  %v559_v41 = vpop.f32.mrb[0].mxu1 }
 0x11d   :  { %v174_v42 = vpop.f32.mrb[1].mxu0  ;;  %v214_v43 = vpop.f32.mrb[1].mxu1 }
 0x11e   :  { %v437_v44 = vpack.c.bf16 %v547_v40, %v174_v42  ;;  %v457_v45 = vpack.c.bf16 %v559_v41, %v214_v43 }
 0x120   :  { %438 = vst [vmem:[#allocation8] sm:$0xff] %v437_v44   ;;  %477 = vst [vmem:[#allocation8 + $0x20] sm:$0xff] %v457_v45   ;;  %v550_v46 = vpop.f32.mrb[2].mxu0  ;;  %v562_v47 = vpop.f32.mrb[2].mxu1 }
 0x121   :  { %v184_v48 = vpop.f32.mrb[3].mxu0  ;;  %v224_v49 = vpop.f32.mrb[3].mxu1 }
 0x122   :  { %v442_v50 = vpack.c.bf16 %v550_v46, %v184_v48  ;;  %v462_v51 = vpack.c.bf16 %v562_v47, %v224_v49 }
 0x124   :  { %474 = vst [vmem:[#allocation8 + $0x8] sm:$0xff] %v442_v50   ;;  %478 = vst [vmem:[#allocation8 + $0x28] sm:$0xff] %v462_v51   ;;  %v553_v52 = vpop.f32.mrb[4].mxu0  ;;  %v565_v53 = vpop.f32.mrb[4].mxu1 }
 0x125   :  { %v194_v54 = vpop.f32.mrb[5].mxu0  ;;  %v234_v55 = vpop.f32.mrb[5].mxu1 }
 0x126   :  { %v447_v56 = vpack.c.bf16 %v553_v52, %v194_v54  ;;  %v467_v57 = vpack.c.bf16 %v565_v53, %v234_v55 }
 0x128   :  { %475 = vst [vmem:[#allocation8 + $0x10] sm:$0xff] %v447_v56   ;;  %479 = vst [vmem:[#allocation8 + $0x30] sm:$0xff] %v467_v57   ;;  %v556_v58 = vpop.f32.mrb[6].mxu0  ;;  %v568_v59 = vpop.f32.mrb[6].mxu1 }
 0x129   :  { %v204_v60 = vpop.f32.mrb[7].mxu0  ;;  %v244_v61 = vpop.f32.mrb[7].mxu1 }
 0x12a   :  { %v452_v62 = vpack.c.bf16 %v556_v58, %v204_v60  ;;  %v472_v63 = vpack.c.bf16 %v568_v59, %v244_v61 }
 0x12c   :  { %476 = vst [vmem:[#allocation8 + $0x18] sm:$0xff] %v452_v62   ;;  %480 = vst [vmem:[#allocation8 + $0x38] sm:$0xff] %v472_v63  }
 0x12d   :  { %679 = shalt.err (!%p676_p6)
}
 0x12e   :  { %s680_s10 = scalar_lea.hbm %s756_s2, 1024 }
 0x12f   :  { %p681_p7 = scmp.ne.s32.totalorder %s756_s2, %s680_s10  ;;  %p684_p8 = scmp.lt.u32.totalorder %s680_s10, %s756_s2 }
 0x131   :  { %p686_p9 = pnand %p684_p8, %p681_p7 }
 0x133   :  { %689 = shalt.err (!%p686_p9)
}
 0x134   :  { %s701_s15 = smov 64   ;;  %s702_s16 = smov 4  }
 0x135   :  { %395 = dma.vmem_to_hbm [thread:$0]  %s390_s6, 1024, %s756_s2, [#allocation5], %s701_s15, %s701_s15, %s702_s16  }
 0x136   :  { %694 = dma.done.wait [#allocation5], 1024  }
 0x137   :  { %695 = vsyncadd [#allocation5], 4294966272 }
 0x138   :  { %399 = vsyncpa [#allocation4], 1 }
 0x139   :  { %400 = vsyncpa [#allocation7], 1 }
 0x13a   :  { %401 = vsyncpa [#allocation5], 1 }

</bundles_post_ra>
